<compile_context>
chip_gen: v7x
topology: tpu7x:2x2x1
jax: 0.10.0
libtpu: 0.0.40
codegen_flags: <defaults>
</compile_context>

<pallas_src>
import numpy as np
import jax
import jax.numpy as jnp
from jax.experimental import pallas as pl
from jax.experimental.pallas import tpu as pltpu


def _round_up(x, m):
    return ((x + m - 1) // m) * m


# ----------------------------------------------------------------------------
# Deterministic parameter construction (mirrors nnAudio create_fourier_kernels
# with freq_scale='no', window='hann' (periodic), win_length == n_fft,
# trainable=False).
# ----------------------------------------------------------------------------
def make_stft_kernels(n_fft: int, freq_bins: int):
    s = np.arange(0, n_fft, 1.0)
    # periodic hann window (scipy.signal.get_window('hann', n, fftbins=True))
    window = 0.5 - 0.5 * np.cos(2.0 * np.pi * np.arange(n_fft) / n_fft)
    k = np.arange(freq_bins, dtype=np.float64)[:, None]      # binslist[k] = k
    kernel_cos = np.cos(2.0 * np.pi * k * s[None, :] / n_fft)
    kernel_sin = np.sin(2.0 * np.pi * k * s[None, :] / n_fft)
    wcos = (kernel_cos * window[None, :]).astype(np.float32)  # (F, n_fft)
    wsin = (kernel_sin * window[None, :]).astype(np.float32)  # (F, n_fft)
    return jnp.asarray(wcos), jnp.asarray(wsin)


# ----------------------------------------------------------------------------
# Pallas kernel: one fused dot per (batch, time-tile) grid point.
# ----------------------------------------------------------------------------
def _stft_mag_kernel(frames_ref, w_ref, out_ref):
    # frames_ref: (n_fft, tile_t)   one batch row, one time tile (time on lanes)
    # w_ref:      (2*F_pad, n_fft)  fused, pre-oriented cos/sin Fourier kernels
    # out_ref:    (F_pad, tile_t)
    f_pad = out_ref.shape[0]
    prod = jnp.dot(w_ref[...], frames_ref[...],
                   preferred_element_type=jnp.float32)        # (2*F_pad, tile_t)
    real = prod[:f_pad, :]
    imag = prod[f_pad:, :]
    # Magnitude (non-trainable nnAudio STFT: no eps inside the sqrt)
    out_ref[...] = jnp.sqrt(real * real + imag * imag)


def stft_magnitude_pallas(frames_t, w_fused, f_pad, *, tile_t):
    """frames_t: (B, n_fft, T_pad) f32 ; w_fused: (2*F_pad, n_fft) f32.
    Returns (B, F_pad, T_pad) f32 magnitudes (time on the lane axis)."""
    B, n_fft, T_pad = frames_t.shape
    assert T_pad % tile_t == 0
    grid = (B, T_pad // tile_t)

    flops = 2 * (2 * f_pad) * n_fft * B * T_pad
    bytes_accessed = 4 * (B * n_fft * T_pad + int(w_fused.size) + B * f_pad * T_pad)
    cost = pl.CostEstimate(flops=flops,
                           transcendentals=B * f_pad * T_pad,   # sqrt
                           bytes_accessed=bytes_accessed)

    return pl.pallas_call(
        _stft_mag_kernel,
        out_shape=jax.ShapeDtypeStruct((B, f_pad, T_pad), jnp.float32),
        grid_spec=pltpu.PrefetchScalarGridSpec(
            num_scalar_prefetch=0,
            grid=grid,
            in_specs=[
                pl.BlockSpec((None, n_fft, tile_t), lambda b, t: (b, 0, t)),
                # Constant index_map -> the fused weight stays VMEM-resident.
                # TODO(synk): for production nnAudio sizes (n_fft=2048, F=1025)
                # single-buffer this block (pipeline_mode=pl.Buffered(1)) and add
                # a K-reduction grid axis so the working set fits v7x's 64 MiB VMEM.
                pl.BlockSpec((2 * f_pad, n_fft), lambda b, t: (0, 0)),
            ],
            out_specs=pl.BlockSpec((None, f_pad, tile_t), lambda b, t: (b, 0, t)),
        ),
        compiler_params=pltpu.CompilerParams(
            dimension_semantics=("parallel", "parallel")),
        cost_estimate=cost,
    )(frames_t, w_fused)


# ----------------------------------------------------------------------------
# Full forward: STFTnnAudio.forward(waveform) -> (B, 1, F, T)
# ----------------------------------------------------------------------------
def stft_nnaudio_forward(waveform, wcos, wsin, *, n_fft, hop_length, tile_t=512):
    B, L = waveform.shape
    F = wcos.shape[0]
    pad = n_fft // 2
    assert L > pad, "reflect padding requires L > n_fft // 2"

    # nnAudio STFT: center=True, pad_mode='reflect'
    x = jnp.pad(waveform, ((0, 0), (pad, pad)), mode="reflect")
    T = (L + 2 * pad - n_fft) // hop_length + 1

    f_pad = _round_up(F, 128)
    tile_t = min(tile_t, _round_up(T, 128))
    T_pad = _round_up(T, tile_t)

    # Fused, pre-oriented Fourier weight: rows [0:F)=cos, [f_pad:f_pad+F)=sin.
    w_fused = jnp.zeros((2 * f_pad, n_fft), jnp.float32)
    w_fused = w_fused.at[:F].set(wcos).at[f_pad:f_pad + F].set(wsin)

    # Frame extraction with time LAST: frames_t[b, n, t] = x[b, t*hop + n].
    # TODO(synk): this materializes ~(n_fft/hop)x the waveform bytes in HBM; a fully
    # HBM-optimal version would frame inside the kernel by DMAing one contiguous
    # waveform window per time tile (manual pltpu.make_async_copy).
    idx = jnp.arange(n_fft)[:, None] + jnp.arange(T)[None, :] * hop_length   # (n_fft, T)
    frames_t = x[:, idx]                                                     # (B, n_fft, T)
    frames_t = jnp.pad(frames_t, ((0, 0), (0, 0), (0, T_pad - T)))

    mag = stft_magnitude_pallas(frames_t, w_fused, f_pad, tile_t=tile_t)     # (B, F_pad, T_pad)
    spec = mag[:, :F, :T]                         # (B, F, T) -- already freq x time
    return spec[:, None, :, :]                    # unsqueeze(1) -> (B, 1, F, T)


if __name__ == "__main__":
    # Small shapes consistent with the module (n_fft == win_length == filter_length)
    filter_length = 64
    hop_length = 16
    bins = 32
    B, L = 2, 256

    key = jax.random.PRNGKey(0)
    waveform = jax.random.normal(key, (B, L), dtype=jnp.float32)

    wcos, wsin = make_stft_kernels(filter_length, bins)

    out = stft_nnaudio_forward(waveform, wcos, wsin,
                               n_fft=filter_length, hop_length=hop_length)
    out = jax.block_until_ready(out)

    # float64 NumPy reference of the full forward (framing, matmul, magnitude, layout)
    wv = np.asarray(waveform, dtype=np.float64)
    wc = np.asarray(wcos, dtype=np.float64)
    ws = np.asarray(wsin, dtype=np.float64)
    pad = filter_length // 2
    x_ref = np.pad(wv, ((0, 0), (pad, pad)), mode="reflect")
    T = (L + 2 * pad - filter_length) // hop_length + 1
    idx = np.arange(T)[:, None] * hop_length + np.arange(filter_length)[None, :]
    frames = x_ref[:, idx]                                    # (B, T, n_fft)
    real = frames @ wc.T
    imag = frames @ ws.T
    ref = np.sqrt(real * real + imag * imag).transpose(0, 2, 1)[:, None]   # (B,1,F,T)

    assert out.shape == (B, 1, bins, T), out.shape
    # Tolerance allows for TPU MXU reduced-precision f32 passes.
    np.testing.assert_allclose(np.asarray(out, dtype=np.float64), ref,
                               rtol=1e-2, atol=1e-2)
    print("KERNEL_OK")
</pallas_src>

<mosaic_0001>
module attributes {stable_mosaic.version = 11 : i64} {
  func.func @_stft_mag_kernel(%arg0: i32, %arg1: i32, %arg2: memref<1x64x128xf32, #tpu.memory_space<vmem>>, %arg3: memref<256x64xf32, #tpu.memory_space<vmem>>, %arg4: memref<1x128x128xf32, #tpu.memory_space<vmem>>) attributes {dimension_semantics = [#tpu.dimension_semantics<parallel>, #tpu.dimension_semantics<parallel>], iteration_bounds = array<i64: 2, 1>, scalar_prefetch = 0 : i64, scratch_operands = 0 : i64, tpu.core_type = #tpu.core_type<tc>, window_params = [{transform_indices = @transform_0, window_bounds = array<i64: 1, 64, 128>}, {pipeline_mode = #tpu.pipeline_mode<synchronous>, transform_indices = @transform_1, window_bounds = array<i64: 256, 64>}, {transform_indices = @transform_2, window_bounds = array<i64: 1, 128, 128>}]} {
    %c0 = arith.constant 0 : index
    %c0_0 = arith.constant 0 : index
    %0 = vector.load %arg3[%c0, %c0_0] : memref<256x64xf32, #tpu.memory_space<vmem>>, vector<256x64xf32>
    %c0_1 = arith.constant 0 : index
    %c0_2 = arith.constant 0 : index
    %c0_3 = arith.constant 0 : index
    %1 = vector.load %arg2[%c0_1, %c0_2, %c0_3] : memref<1x64x128xf32, #tpu.memory_space<vmem>>, vector<1x64x128xf32>
    %2 = vector.shape_cast %1 : vector<1x64x128xf32> to vector<64x128xf32>
    %cst = arith.constant dense<0.000000e+00> : vector<256x128xf32>
    %3 = tpu.matmul %0, %2, %cst {dimension_numbers = #tpu.dot_dimension_numbers<[1], [0], [0], [1], [0, 0, 1, 1], [], []>} : vector<256x64xf32>, vector<64x128xf32>, vector<256x128xf32> -> vector<256x128xf32>
    %4 = vector.extract_strided_slice %3 {offsets = [0, 0], sizes = [128, 128], strides = [1, 1]} : vector<256x128xf32> to vector<128x128xf32>
    %5 = vector.extract_strided_slice %3 {offsets = [128, 0], sizes = [128, 128], strides = [1, 1]} : vector<256x128xf32> to vector<128x128xf32>
    %6 = arith.mulf %4, %4 : vector<128x128xf32>
    %7 = arith.mulf %5, %5 : vector<128x128xf32>
    %8 = arith.addf %6, %7 : vector<128x128xf32>
    %9 = math.sqrt %8 : vector<128x128xf32>
    %c0_4 = arith.constant 0 : index
    %c0_5 = arith.constant 0 : index
    %c0_6 = arith.constant 0 : index
    %10 = vector.load %arg4[%c0_4, %c0_5, %c0_6] : memref<1x128x128xf32, #tpu.memory_space<vmem>>, vector<1x128x128xf32>
    %11 = vector.shape_cast %10 : vector<1x128x128xf32> to vector<128x128xf32>
    %12 = vector.shape_cast %9 : vector<128x128xf32> to vector<1x128x128xf32>
    tpu.vector_store %arg4[%c0_4, %c0_5, %c0_6], %12 {strides = array<i32>} : memref<1x128x128xf32, #tpu.memory_space<vmem>>, vector<1x128x128xf32>,
    return
  }
  func.func @transform_0(%arg0: i32, %arg1: i32) -> (i32, i32, i32) {
    %c0_i32 = arith.constant 0 : i32
    %c0_i32_0 = arith.constant 0 : i32
    return %arg0, %c0_i32, %arg1 : i32, i32, i32
  }
  func.func @transform_1(%arg0: i32, %arg1: i32) -> (i32, i32) {
    %c0_i32 = arith.constant 0 : i32
    %c0_i32_0 = arith.constant 0 : i32
    %c0_i32_1 = arith.constant 0 : i32
    return %c0_i32, %c0_i32_0 : i32, i32
  }
  func.func @transform_2(%arg0: i32, %arg1: i32) -> (i32, i32, i32) {
    %c0_i32 = arith.constant 0 : i32
    %c0_i32_0 = arith.constant 0 : i32
    return %arg0, %c0_i32, %arg1 : i32, i32, i32
  }
}

</mosaic_0001>

<bundles_post_ra>
// kernel: tpu_custom_call.1
= control target key start
LH: loop header
LB: loop body
LE: loop exit
PB: predicated region body
PF: predicated region fallthrough
CT: control target
= control target key end

     0   :  { %7 = vsyncpa [#allocation3], 0  ;;  %s1538_s0 = inlined_call_operand.vmem [shape: f32[2,64,128], index: 0, kind: input, shape index: {}]   ;;  %s1539_s1 = inlined_call_operand.vmem [shape: f32[256,64], index: 1, kind: input, shape index: {}]   ;;  %s1540_s2 = inlined_call_operand.hbm [shape: f32[2,128,128], index: 2, kind: output, shape index: {}]  }
   0x1   :  { %9 = vsyncpa [#allocation3 + $0x1], 0  ;;  %s1160_s9 = smov 0   ;;  %s1162_s10 = smov 0  }
   0x2   :  { %s1164_s11 = smov 0   ;;  %s1166_s12 = smov 0  }
   0x3   :  { %s1168_s13 = smov 0   ;;  %s1170_s14 = smov 0  }
   0x4 LB: > { %s798_s15 = sadd.s32 4294967295, %s1140_s14   ;;  %s799_s16 = sadd.s32 4294967294, %s1140_s14   ;;  %s1140_s14 = sphi %s1170_s14, %s15_s14   ;;  %s1136_s13 = sphi %s1168_s13, %s1547_s13   ;;  %s1132_s12 = sphi %s1166_s12, %s1546_s12   ;;  %s1128_s11 = sphi %s1164_s11, %s1545_s11   ;;  %s1124_s10 = sphi %s1162_s10, %s1544_s10   ;;  %s1120_s9 = sphi %s1160_s9, %s1543_s9  }
   0x5   : > { %s27_s17 = sadd.s32 1, %s1136_s13  ;;  %s85_s18 = sadd.s32 1, %s1128_s11 }
   0x6   : > { %p29_p0 = scmp.ge.s32.totalorder %s27_s17, 2  ;;  %p95_p1 = scmp.ne.s32.totalorder %s1128_s11, %s1124_s10 }
   0x7   : > { %p96_p2 = scmp.eq.s32.totalorder %s798_s15, 1  ;;  %p101_p3 = scmp.ne.s32.totalorder %s1124_s10, %s1120_s9 }
   0x8   : > { %s1549_s17 = smov (%p29_p0, %s27_s17), 0  ;;  %p102_p5 = scmp.eq.s32.totalorder %s799_s16, 1 }
   0x9   : > { %p1200_p4 = por %p96_p2, %p95_p1  ;;  %s80_s20 = ssub.s32 %s1136_s13, %s1549_s17 }
   0xa   : > { %p802_p6 = scmp.ge.s32.totalorder %s1140_s14, 1  ;;  %p83_p7 = scmp.eq.s32.totalorder %s80_s20, 0 }
   0xb   : > { %p1207_p8 = por %p102_p5, %p101_p3  ;;  %p134_p9 = scmp.lt.s32.totalorder %s1140_s14, 3 }
   0xc   : > { %s1213_s22 = scalar_select %p83_p7, %s1128_s11, %s85_s18  }
   0xd   : > { %p135_p10 = pnand %p802_p6, %p134_p9 }
   0xe   : > { %p159_p11 = scmp.lt.s32.totalorder (!%p135_p10), %s1132_s12, 1  ;;  %v167_v0 = vld [vmem:[%s1539_s1] sm:$0xff] (!%p135_p10)  ;;  %vm207_vm0 = vcmask (!%p135_p10), 523264   ;;  %v168_v14 = vld [vmem:[%s1539_s1 + $0x8] sm:$0xff] (!%p135_p10)  ;;  %v169_v16 = vld [vmem:[%s1539_s1 + $0x10] sm:$0xff] (!%p135_p10)  ;;  %s156_s16 = sand.u32 (!%p135_p10), 1, %s1124_s10  }
   0xf   : > { %138 = sbr.rel (%p135_p10) target bundleno = 323 (0x143), region = 28  ;;  %v183_v1 = vld [vmem:[%s1539_s1 + $0x80] sm:$0xff] (!%p135_p10)  ;;  %901 = vmatprep.mubr.msk.f32.mxu0 (!%p135_p10), %vm207_vm0, %v167_v0  ;;  %v184_v15 = vld [vmem:[%s1539_s1 + $0x88] sm:$0xff] (!%p135_p10)  ;;  %v185_v17 = vld [vmem:[%s1539_s1 + $0x90] sm:$0xff] (!%p135_p10)  ;;  %s803_s18 = sshll.u32 (!%p135_p10), %s156_s16, 7 }
  0x10   : > { %925 = vmatprep.mubr.msk.f32.mxu1 (!%p135_p10), %vm207_vm0, %v183_v1  ;;  %v170_v18 = vld [vmem:[%s1539_s1 + $0x18] sm:$0xff] (!%p135_p10)  ;;  %v171_v20 = vld [vmem:[%s1539_s1 + $0x20] sm:$0xff] (!%p135_p10)  ;;  %v172_v22 = vld [vmem:[%s1539_s1 + $0x28] sm:$0xff] (!%p135_p10)  ;;  %s1382_s20 = scalar_lea.vmem (!%p135_p10), [#allocation2], %s803_s18  ;;  %s844_s23 = sshll.u32 (!%p135_p10), %s1132_s12, 11 }
  0x11   : > { %v186_v19 = vld [vmem:[%s1539_s1 + $0x98] sm:$0xff] (!%p135_p10)  ;;  %v187_v21 = vld [vmem:[%s1539_s1 + $0xa0] sm:$0xff] (!%p135_p10)  ;;  %v188_v23 = vld [vmem:[%s1539_s1 + $0xa8] sm:$0xff] (!%p135_p10)  ;;  %s720_s24 = sshll.u32 (!%p135_p10), %s1382_s20, 4  ;;  %s1142_s29 = smov (!%p135_p10), [#allocation2]   ;;  %s1487_s24 = int_to_ptr.vmem [resolvable:$true] %s720_s24 }
  0x12   : > { %v173_v24 = vld [vmem:[%s1539_s1 + $0x30] sm:$0xff] (!%p135_p10)  ;;  %v174_v26 = vld [vmem:[%s1539_s1 + $0x38] sm:$0xff] (!%p135_p10)  ;;  %v175_v28 = vld [vmem:[%s1539_s1 + $0x40] sm:$0xff] (!%p135_p10)  ;;  %s1066_s30 = sshll.u32 (!%p135_p10), %s1142_s29, 4  ;;  %s1067_s30 = int_to_ptr.vmem [resolvable:$false] %s1066_s30 }
  0x13   : > { %v189_v25 = vld [vmem:[%s1539_s1 + $0xb0] sm:$0xff] (!%p135_p10)  ;;  %v190_v27 = vld [vmem:[%s1539_s1 + $0xb8] sm:$0xff] (!%p135_p10)  ;;  %v191_v29 = vld [vmem:[%s1539_s1 + $0xc0] sm:$0xff] (!%p135_p10)  ;;  %p1069_p1 = scmp.lt.s32.totalorder (!%p135_p10), %s1487_s24, %s1067_s30 }
  0x14   : > { %v176_v30 = vld [vmem:[%s1539_s1 + $0x48] sm:$0xff] (!%p135_p10)  ;;  %v177_v32 = vld [vmem:[%s1539_s1 + $0x50] sm:$0xff] (!%p135_p10)  ;;  %v178_v34 = vld [vmem:[%s1539_s1 + $0x58] sm:$0xff] (!%p135_p10) }
  0x15   : > { %v192_v31 = vld [vmem:[%s1539_s1 + $0xc8] sm:$0xff] (!%p135_p10)  ;;  %v193_v33 = vld [vmem:[%s1539_s1 + $0xd0] sm:$0xff] (!%p135_p10)  ;;  %v194_v35 = vld [vmem:[%s1539_s1 + $0xd8] sm:$0xff] (!%p135_p10) }
  0x16   : > { %s160_s27 = scalar_select %p159_p11, %s1132_s12, 1  ;;  %v179_v36 = vld [vmem:[%s1539_s1 + $0x60] sm:$0xff]  ;;  %v180_v38 = vld [vmem:[%s1539_s1 + $0x68] sm:$0xff]  ;;  %v181_v40 = vld [vmem:[%s1539_s1 + $0x70] sm:$0xff] }
  0x17   : > { %v195_v37 = vld [vmem:[%s1539_s1 + $0xe0] sm:$0xff]  ;;  %v196_v39 = vld [vmem:[%s1539_s1 + $0xe8] sm:$0xff]  ;;  %v197_v41 = vld [vmem:[%s1539_s1 + $0xf0] sm:$0xff]  ;;  %s1492_s12 = scalar_lea.sflag [#allocation3], %s156_s16 }
  0x18   : > { %s843_s28 = sshll.u32 %s160_s27, 6  ;;  %v182_v42 = vld [vmem:[%s1539_s1 + $0x78] sm:$0xff]  ;;  %s1485_s27 = scalar_lea.hbm %s1540_s2, %s844_s23 }
  0x19   : > { %s166_s3 = scalar_lea.vmem %s1538_s0, %s843_s28  ;;  %v198_v43 = vld [vmem:[%s1539_s1 + $0xf8] sm:$0xff]  ;;  %s1062_s28 = scalar_lea.vmem %s1487_s24, 2048 }
  0x1a   : > { %v199_v2 = vld [vmem:[%s166_s3] sm:$0xff]  ;;  %v200_v3 = vld [vmem:[%s166_s3 + $0x8] sm:$0xff]  ;;  %v201_v4 = vld [vmem:[%s166_s3 + $0x10] sm:$0xff]  ;;  %p1063_p12 = scmp.ne.s32.totalorder %s1487_s24, %s1062_s28 }
  0x1b   : > { %v949_v5 = vpack.c.bf16 %v200_v3, %v199_v2  ;;  %v202_v6 = vld [vmem:[%s166_s3 + $0x18] sm:$0xff]  ;;  %v203_v8 = vld [vmem:[%s166_s3 + $0x20] sm:$0xff]  ;;  %v204_v9 = vld [vmem:[%s166_s3 + $0x28] sm:$0xff] }
  0x1c   : > { %v953_v7 = vpack.c.bf16 %v202_v6, %v201_v4  ;;  %v957_v10 = vpack.c.bf16 %v204_v9, %v203_v8  ;;  %v205_v11 = vld [vmem:[%s166_s3 + $0x30] sm:$0xff]  ;;  %v206_v12 = vld [vmem:[%s166_s3 + $0x38] sm:$0xff]  ;;  %p1064_p13 = pnand %p1063_p12, %p1200_p4  ;;  %s1068_s3 = scalar_lea.vmem %s1067_s30, 4096 }
  0x1d   : > { %950 = vmatprep.subr.bf16.mxu0 %v949_v5  ;;  %965 = vmatprep.subr.bf16.mxu1 %v949_v5  ;;  %v961_v13 = vpack.c.bf16 %v206_v12, %v205_v11  ;;  %p1070_p2 = scmp.lt.s32.totalorder %s1068_s3, %s1062_s28 }
  0x1e   : > { %952 = vmatpush3.bf16.msra.mxu0 %v949_v5  ;;  %969 = vmatpush3.bf16.msra.mxu1 %v949_v5  ;;  %p1065_p0 = pneg %p1064_p13 }
  0x1f   : > { %954 = vmatprep.subr.bf16.mxu0 %v953_v7  ;;  %966 = vmatprep.subr.bf16.mxu1 %v953_v7  ;;  %p1071_p3 = por %p1070_p2, %p1069_p1 }
  0x21   : > { %p1072_p5 = pnand %p1071_p3, %p1065_p0 }
  0x22   : > { %956 = vmatpush3.bf16.msra.mxu0 %v953_v7  ;;  %970 = vmatpush3.bf16.msra.mxu1 %v953_v7 }
  0x23   : > { %958 = vmatprep.subr.bf16.mxu0 %v957_v10  ;;  %967 = vmatprep.subr.bf16.mxu1 %v957_v10 }
  0x26   : > { %960 = vmatpush3.bf16.msra.mxu0 %v957_v10  ;;  %971 = vmatpush3.bf16.msra.mxu1 %v957_v10 }
  0x27   : > { %962 = vmatprep.subr.bf16.mxu0 %v961_v13  ;;  %968 = vmatprep.subr.bf16.mxu1 %v961_v13 }
  0x2a   : > { %964 = vmatpush3.bf16.msra.mxu0 %v961_v13  ;;  %972 = vmatpush3.bf16.msra.mxu1 %v961_v13 }
  0x2d   : > { %902 = vmatmul.mubr.msk.f32.vlgmr.msra.gmra.mrb[0].mxu0 %vm207_vm0, %v168_v14  ;;  %926 = vmatmul.mubr.msk.f32.vlgmr.msra.gmra.mrb[0].mxu1 %vm207_vm0, %v184_v15 }
  0x2e   : > { %904 = vmatprep.mubr.msk.f32.mxu0 %vm207_vm0, %v169_v16  ;;  %928 = vmatprep.mubr.msk.f32.mxu1 %vm207_vm0, %v185_v17 }
  0x31   : > { %905 = vmatmul.mubr.msk.f32.gmra.mrb[2].mxu0 %vm207_vm0, %v170_v18  ;;  %929 = vmatmul.mubr.msk.f32.gmra.mrb[2].mxu1 %vm207_vm0, %v186_v19 }
  0x32   : > { %907 = vmatprep.mubr.msk.f32.mxu0 %vm207_vm0, %v171_v20  ;;  %931 = vmatprep.mubr.msk.f32.mxu1 %vm207_vm0, %v187_v21 }
  0x35   : > { %908 = vmatmul.mubr.msk.f32.gmra.mrb[4].mxu0 %vm207_vm0, %v172_v22  ;;  %932 = vmatmul.mubr.msk.f32.gmra.mrb[4].mxu1 %vm207_vm0, %v188_v23 }
  0x36   : > { %910 = vmatprep.mubr.msk.f32.mxu0 %vm207_vm0, %v173_v24  ;;  %934 = vmatprep.mubr.msk.f32.mxu1 %vm207_vm0, %v189_v25 }
  0x39   : > { %911 = vmatmul.mubr.msk.f32.gmra.mrb[6].mxu0 %vm207_vm0, %v174_v26  ;;  %935 = vmatmul.mubr.msk.f32.gmra.mrb[6].mxu1 %vm207_vm0, %v190_v27 }
  0x3a   : > { %913 = vmatprep.mubr.msk.f32.mxu0 %vm207_vm0, %v175_v28  ;;  %937 = vmatprep.mubr.msk.f32.mxu1 %vm207_vm0, %v191_v29 }
  0x3d   : > { %914 = vmatmul.mubr.msk.f32.gmra.mrb[8].mxu0 %vm207_vm0, %v176_v30  ;;  %938 = vmatmul.mubr.msk.f32.gmra.mrb[8].mxu1 %vm207_vm0, %v192_v31 }
  0x3e   : > { %916 = vmatprep.mubr.msk.f32.mxu0 %vm207_vm0, %v177_v32  ;;  %940 = vmatprep.mubr.msk.f32.mxu1 %vm207_vm0, %v193_v33 }
  0x41   : > { %917 = vmatmul.mubr.msk.f32.gmra.mrb[10].mxu0 %vm207_vm0, %v178_v34  ;;  %941 = vmatmul.mubr.msk.f32.gmra.mrb[10].mxu1 %vm207_vm0, %v194_v35 }
  0x42   : > { %919 = vmatprep.mubr.msk.f32.mxu0 %vm207_vm0, %v179_v36  ;;  %943 = vmatprep.mubr.msk.f32.mxu1 %vm207_vm0, %v195_v37 }
  0x45   : > { %920 = vmatmul.mubr.msk.f32.gmra.mrb[12].mxu0 %vm207_vm0, %v180_v38  ;;  %944 = vmatmul.mubr.msk.f32.gmra.mrb[12].mxu1 %vm207_vm0, %v196_v39 }
  0x46   : > { %922 = vmatprep.mubr.msk.f32.mxu0 %vm207_vm0, %v181_v40  ;;  %946 = vmatprep.mubr.msk.f32.mxu1 %vm207_vm0, %v197_v41 }
  0x49   : > { %923 = vmatmul.mubr.msk.f32.gmra.mrb[14].mxu0 %vm207_vm0, %v182_v42  ;;  %947 = vmatmul.mubr.msk.f32.gmra.mrb[14].mxu1 %vm207_vm0, %v198_v43 }
 0x100   : > { %v903_v44 = vpop.f32.mrb[0].mxu0  ;;  %v927_v45 = vpop.f32.mrb[0].mxu1 }
 0x101   : > { %v530_v46 = vmul.f32 %v903_v44, %v903_v44  ;;  %v546_v47 = vmul.f32 %v927_v45, %v927_v45  ;;  %v370_v48 = vpop.f32.mrb[1].mxu0  ;;  %v450_v49 = vpop.f32.mrb[1].mxu1 }
 0x102   : > { %v529_v50 = vmul.f32 %v370_v48, %v370_v48  ;;  %v545_v51 = vmul.f32 %v450_v49, %v450_v49 }
 0x103   : > { %v562_v52 = vadd.f32 %v546_v47, %v530_v46 }
 0x104   : > { %v1348_v53 = vadd.f32 %v545_v51, %v529_v50  ;;  %v906_v54 = vpop.f32.mrb[2].mxu0  ;;  %v930_v55 = vpop.f32.mrb[2].mxu1 }
 0x105   : > { %1030 = vrsqrt.f32 %v562_v52  ;;  %v380_v56 = vpop.f32.mrb[3].mxu0  ;;  %v460_v57 = vpop.f32.mrb[3].mxu1  ;;  %v532_v58 = vmul.f32 %v906_v54, %v906_v54  ;;  %v548_v59 = vmul.f32 %v930_v55, %v930_v55  ;;  %vm586_vm1 = vcmp.eq.f32.partialorder %v562_v52, inf }
 0x106   : > { %1032 = vrsqrt.f32 %v1348_v53  ;;  %v531_v60 = vmul.f32 %v380_v56, %v380_v56  ;;  %v547_v61 = vmul.f32 %v460_v57, %v460_v57  ;;  %vm588_vm2 = vcmp.eq.f32.partialorder %v562_v52, 0.0 }
 0x107   : > { %v1351_v0 = vadd.f32 %v548_v59, %v532_v58  ;;  %v589_v19 = vand.u32 2147483648, %v562_v52  ;;  %vm579_vm3 = vcmp.eq.f32.partialorder %v1348_v53, inf  ;;  %vm581_vm4 = vcmp.eq.f32.partialorder %v1348_v53, 0.0 }
 0x108   : > { %v909_v62 = vpop.f32.mrb[4].mxu0  ;;  %v933_v63 = vpop.f32.mrb[4].mxu1  ;;  %v1353_v1 = vadd.f32 %v547_v61, %v531_v60  ;;  %v582_v25 = vand.u32 2147483648, %v1348_v53 }
 0x109   : > { %v534_v2 = vmul.f32 %v909_v62, %v909_v62  ;;  %v550_v3 = vmul.f32 %v933_v63, %v933_v63  ;;  %v390_v4 = vpop.f32.mrb[5].mxu0  ;;  %v470_v5 = vpop.f32.mrb[5].mxu1  ;;  %1034 = vrsqrt.f32 %v1351_v0  ;;  %vm600_vm5 = vcmp.eq.f32.partialorder %v1351_v0, inf }
 0x10a   : > { %v533_v6 = vmul.f32 %v390_v4, %v390_v4  ;;  %v549_v7 = vmul.f32 %v470_v5, %v470_v5  ;;  %1036 = vrsqrt.f32 %v1353_v1  ;;  %vm602_vm6 = vcmp.eq.f32.partialorder %v1351_v0, 0.0 }
 0x10b   : > { %v1358_v10 = vadd.f32 %v550_v3, %v534_v2  ;;  %v603_v36 = vand.u32 2147483648, %v1351_v0  ;;  %vm593_vm7 = vcmp.eq.f32.partialorder %v1353_v1, inf  ;;  %vm595_vm8 = vcmp.eq.f32.partialorder %v1353_v1, 0.0 }
 0x10c   : > { %v912_v8 = vpop.f32.mrb[6].mxu0  ;;  %v936_v9 = vpop.f32.mrb[6].mxu1  ;;  %v1360_v11 = vadd.f32 %v549_v7, %v533_v6  ;;  %v596_v41 = vand.u32 2147483648, %v1353_v1 }
 0x10d   : > { %v536_v12 = vmul.f32 %v912_v8, %v912_v8  ;;  %v552_v13 = vmul.f32 %v936_v9, %v936_v9  ;;  %v400_v14 = vpop.f32.mrb[7].mxu0  ;;  %v480_v15 = vpop.f32.mrb[7].mxu1  ;;  %1038 = vrsqrt.f32 %v1358_v10  ;;  %vm614_vm9 = vcmp.eq.f32.partialorder %v1358_v10, inf }
 0x10e   : > { %v535_v16 = vmul.f32 %v400_v14, %v400_v14  ;;  %v551_v17 = vmul.f32 %v480_v15, %v480_v15  ;;  %1040 = vrsqrt.f32 %v1360_v11  ;;  %vm616_vm10 = vcmp.eq.f32.partialorder %v1358_v10, 0.0 }
 0x10f   : > { %v1031_v18 = vpop.eup %1030  ;;  %v1370_v26 = vadd.f32 %v552_v13, %v536_v12  ;;  %vm607_vm11 = vcmp.eq.f32.partialorder %v1360_v11, inf  ;;  %vm609_vm12 = vcmp.eq.f32.partialorder %v1360_v11, 0.0  ;;  %v610_v5 = vand.u32 2147483648, %v1360_v11 }
 0x110   : > { %v1033_v20 = vpop.eup %1032  ;;  %v585_v21 = vmul.f32 %v1031_v18, %v562_v52  ;;  %v915_v22 = vpop.f32.mrb[8].mxu0  ;;  %v1372_v27 = vadd.f32 %v551_v17, %v535_v16 }
 0x111   : > { %v939_v23 = vpop.f32.mrb[8].mxu1  ;;  %v578_v24 = vmul.f32 %v1033_v20, %v1348_v53  ;;  %v410_v28 = vpop.f32.mrb[9].mxu0  ;;  %v538_v31 = vmul.f32 %v915_v22, %v915_v22  ;;  %1042 = vrsqrt.f32 %v1370_v26  ;;  %vm628_vm13 = vcmp.eq.f32.partialorder %v1370_v26, inf }
 0x112   : > { %v490_v29 = vpop.f32.mrb[9].mxu1  ;;  %v587_v30 = vsel %vm586_vm1, %v562_v52, %v585_v21  ;;  %v554_v32 = vmul.f32 %v939_v23, %v939_v23  ;;  %1044 = vrsqrt.f32 %v1372_v27  ;;  %v537_v37 = vmul.f32 %v410_v28, %v410_v28 }
 0x113   : > { %v590_v33 = vsel %vm588_vm2, %v589_v19, %v587_v30  ;;  %v580_v34 = vsel %vm579_vm3, %v1348_v53, %v578_v24  ;;  %v1035_v40 = vpop.eup %1034  ;;  %v553_v47 = vmul.f32 %v490_v29, %v490_v29  ;;  %v617_v52 = vand.u32 2147483648, %v1358_v10 }
 0x114   : > { %690 = vst [vmem:[%s1382_s20 + $0x8] sm:$0xff] %v590_v33  ;;  %v583_v35 = vsel %vm581_vm4, %v582_v25, %v580_v34  ;;  %v918_v38 = vpop.f32.mrb[10].mxu0  ;;  %v942_v39 = vpop.f32.mrb[10].mxu1  ;;  %v1393_v42 = vadd.f32 %v554_v32, %v538_v31  ;;  %v599_v46 = vmul.f32 %v1035_v40, %v1351_v0  ;;  %vm630_vm14 = vcmp.eq.f32.partialorder %v1370_v26, 0.0 }
 0x115   : > { %689 = vst [vmem:[%s1382_s20] sm:$0xff] %v583_v35  ;;  %v420_v43 = vpop.f32.mrb[11].mxu0  ;;  %v500_v44 = vpop.f32.mrb[11].mxu1  ;;  %v540_v48 = vmul.f32 %v918_v38, %v918_v38  ;;  %v556_v49 = vmul.f32 %v942_v39, %v942_v39  ;;  %v1404_v53 = vadd.f32 %v553_v47, %v537_v37  ;;  %v631_v6 = vand.u32 2147483648, %v1370_v26 }
 0x116   : > { %v1037_v45 = vpop.eup %1036  ;;  %1046 = vrsqrt.f32 %v1393_v42  ;;  %v601_v51 = vsel %vm600_vm5, %v1351_v0, %v599_v46  ;;  %v539_v60 = vmul.f32 %v420_v43, %v420_v43  ;;  %v555_v61 = vmul.f32 %v500_v44, %v500_v44 }
 0x117   : > { %v592_v50 = vmul.f32 %v1037_v45, %v1353_v1  ;;  %v1406_v54 = vadd.f32 %v556_v49, %v540_v48  ;;  %v1039_v57 = vpop.eup %1038  ;;  %v604_v58 = vsel %vm602_vm6, %v603_v36, %v601_v51  ;;  %1048 = vrsqrt.f32 %v1404_v53 }
 0x118   : > { %v921_v55 = vpop.f32.mrb[12].mxu0  ;;  %v945_v56 = vpop.f32.mrb[12].mxu1  ;;  %692 = vst [vmem:[%s1382_s20 + $0x18] sm:$0xff] %v604_v58  ;;  %v613_v4 = vmul.f32 %v1039_v57, %v1358_v10  ;;  %v1433_v14 = vadd.f32 %v555_v61, %v539_v60  ;;  %vm621_vm15 = vcmp.eq.f32.partialorder %v1372_v27, inf  ;;  %vm623_vm0 = vcmp.eq.f32.partialorder %v1372_v27, 0.0 }
 0x119   : > { %v594_v59 = vsel %vm593_vm7, %v1353_v1, %v592_v50  ;;  %v430_v62 = vpop.f32.mrb[13].mxu0  ;;  %v510_v63 = vpop.f32.mrb[13].mxu1  ;;  %1050 = vrsqrt.f32 %v1406_v54  ;;  %v542_v15 = vmul.f32 %v921_v55, %v921_v55  ;;  %v558_v21 = vmul.f32 %v945_v56, %v945_v56 }
 0x11a   : > { %v1041_v2 = vpop.eup %1040  ;;  %v597_v3 = vsel %vm595_vm8, %v596_v41, %v594_v59  ;;  %v615_v1 = vsel %vm614_vm9, %v1358_v10, %v613_v4  ;;  %1052 = vrsqrt.f32 %v1433_v14  ;;  %v541_v22 = vmul.f32 %v430_v62, %v430_v62 }
 0x11b   : > { %691 = vst [vmem:[%s1382_s20 + $0x10] sm:$0xff] %v597_v3  ;;  %v606_v0 = vmul.f32 %v1041_v2, %v1360_v11  ;;  %v1043_v9 = vpop.eup %1042  ;;  %v618_v12 = vsel %vm616_vm10, %v617_v52, %v615_v1  ;;  %v624_v23 = vand.u32 2147483648, %v1372_v27  ;;  %v574_v24 = vadd.f32 %v558_v21, %v542_v15 }
 0x11c   : > { %v924_v7 = vpop.f32.mrb[14].mxu0  ;;  %v948_v8 = vpop.f32.mrb[14].mxu1  ;;  %694 = vst [vmem:[%s1382_s20 + $0x28] sm:$0xff] %v618_v12  ;;  %v627_v20 = vmul.f32 %v1043_v9, %v1370_v26  ;;  %v557_v25 = vmul.f32 %v510_v63, %v510_v63  ;;  %vm642_vm1 = vcmp.eq.f32.partialorder %v1393_v42, inf  ;;  %v645_v35 = vand.u32 2147483648, %v1393_v42 }
 0x11d   : > { %v608_v13 = vsel %vm607_vm11, %v1360_v11, %v606_v0  ;;  %v440_v16 = vpop.f32.mrb[15].mxu0  ;;  %v520_v17 = vpop.f32.mrb[15].mxu1  ;;  %v544_v31 = vmul.f32 %v924_v7, %v924_v7  ;;  %v560_v32 = vmul.f32 %v948_v8, %v948_v8  ;;  %1054 = vrsqrt.f32 %v574_v24 }
 0x11e   : > { %v1045_v18 = vpop.eup %1044  ;;  %v611_v19 = vsel %vm609_vm12, %v610_v5, %v608_v13  ;;  %v629_v11 = vsel %vm628_vm13, %v1370_v26, %v627_v20  ;;  %v573_v36 = vadd.f32 %v557_v25, %v541_v22  ;;  %vm644_vm2 = vcmp.eq.f32.partialorder %v1393_v42, 0.0 }
 0x11f   : > { %693 = vst [vmem:[%s1382_s20 + $0x20] sm:$0xff] %v611_v19  ;;  %v620_v10 = vmul.f32 %v1045_v18, %v1372_v27  ;;  %v632_v29 = vsel %vm630_vm14, %v631_v6, %v629_v11  ;;  %v576_v37 = vadd.f32 %v560_v32, %v544_v31  ;;  %v559_v39 = vmul.f32 %v520_v17, %v520_v17 }
 0x120   : > { %v1047_v28 = vpop.eup %1046  ;;  %696 = vst [vmem:[%s1382_s20 + $0x38] sm:$0xff] %v632_v29  ;;  %1056 = vrsqrt.f32 %v573_v36  ;;  %vm635_vm3 = vcmp.eq.f32.partialorder %v1404_v53, inf  ;;  %v638_v44 = vand.u32 2147483648, %v1404_v53  ;;  %vm637_vm4 = vcmp.eq.f32.partialorder %v1404_v53, 0.0 }
 0x121   : > { %v622_v30 = vsel %vm621_vm15, %v1372_v27, %v620_v10  ;;  %v641_v34 = vmul.f32 %v1047_v28, %v1393_v42  ;;  %v1049_v38 = vpop.eup %1048  ;;  %v543_v27 = vmul.f32 %v440_v16, %v440_v16  ;;  %1058 = vrsqrt.f32 %v576_v37 }
 0x122   : > { %v625_v33 = vsel %vm623_vm0, %v624_v23, %v622_v30  ;;  %v634_v43 = vmul.f32 %v1049_v38, %v1404_v53  ;;  %vm656_vm5 = vcmp.eq.f32.partialorder %v1406_v54, inf  ;;  %vm658_vm6 = vcmp.eq.f32.partialorder %v1406_v54, 0.0 }
 0x123   : > { %695 = vst [vmem:[%s1382_s20 + $0x30] sm:$0xff] %v625_v33  ;;  %v643_v26 = vsel %vm642_vm1, %v1393_v42, %v641_v34  ;;  %v1051_v40 = vpop.eup %1050  ;;  %v659_v42 = vand.u32 2147483648, %v1406_v54  ;;  %v575_v49 = vadd.f32 %v559_v39, %v543_v27  ;;  %vm649_vm7 = vcmp.eq.f32.partialorder %v1433_v14, inf }
 0x124   : > { %v646_v41 = vsel %vm644_vm2, %v645_v35, %v643_v26  ;;  %v655_v45 = vmul.f32 %v1051_v40, %v1406_v54  ;;  %v636_v46 = vsel %vm635_vm3, %v1404_v53, %v634_v43  ;;  %v1053_v50 = vpop.eup %1052  ;;  %v652_v53 = vand.u32 2147483648, %v1433_v14 }
 0x125   : > { %698 = vst [vmem:[%s1382_s20 + $0x48] sm:$0xff] %v646_v41  ;;  %v639_v47 = vsel %vm637_vm4, %v638_v44, %v636_v46  ;;  %v648_v52 = vmul.f32 %v1053_v50, %v1433_v14  ;;  %1060 = vrsqrt.f32 %v575_v49  ;;  %vm651_vm8 = vcmp.eq.f32.partialorder %v1433_v14, 0.0 }
 0x126   : > { %v657_v48 = vsel %vm656_vm5, %v1406_v54, %v655_v45  ;;  %697 = vst [vmem:[%s1382_s20 + $0x40] sm:$0xff] %v639_v47  ;;  %vm670_vm9 = vcmp.eq.f32.partialorder %v574_v24, inf  ;;  %v673_v58 = vand.u32 2147483648, %v574_v24  ;;  %vm672_vm10 = vcmp.eq.f32.partialorder %v574_v24, 0.0 }
 0x127   : > { %v660_v51 = vsel %vm658_vm6, %v659_v42, %v657_v48  ;;  %v1055_v55 = vpop.eup %1054  ;;  %v650_v56 = vsel %vm649_vm7, %v1433_v14, %v648_v52  ;;  %vm663_vm11 = vcmp.eq.f32.partialorder %v573_v36, inf  ;;  %v666_v2 = vand.u32 2147483648, %v573_v36 }
 0x128   : > { %700 = vst [vmem:[%s1382_s20 + $0x58] sm:$0xff] %v660_v51  ;;  %v653_v57 = vsel %vm651_vm8, %v652_v53, %v650_v56  ;;  %v669_v54 = vmul.f32 %v1055_v55, %v574_v24  ;;  %vm665_vm12 = vcmp.eq.f32.partialorder %v573_v36, 0.0  ;;  %vm684_vm13 = vcmp.eq.f32.partialorder %v576_v37, inf }
 0x129   : > { %699 = vst [vmem:[%s1382_s20 + $0x50] sm:$0xff] %v653_v57  ;;  %v687_v0 = vand.u32 2147483648, %v576_v37  ;;  %vm686_vm14 = vcmp.eq.f32.partialorder %v576_v37, 0.0  ;;  %vm677_vm15 = vcmp.eq.f32.partialorder %v575_v49, inf  ;;  %v680_v9 = vand.u32 2147483648, %v575_v49 }
 0x12a   : > { %v1057_v59 = vpop.eup %1056  ;;  %v671_v60 = vsel %vm670_vm9, %v574_v24, %v669_v54  ;;  %vm679_vm0 = vcmp.eq.f32.partialorder %v575_v49, 0.0 }
 0x12b   : > { %v1059_v61 = vpop.eup %1058  ;;  %v674_v62 = vsel %vm672_vm10, %v673_v58, %v671_v60  ;;  %v662_v63 = vmul.f32 %v1057_v59, %v573_v36 }
 0x12c   : > { %702 = vst [vmem:[%s1382_s20 + $0x68] sm:$0xff] %v674_v62  ;;  %v683_v3 = vmul.f32 %v1059_v61, %v576_v37 }
 0x12d   : > { %v664_v4 = vsel %vm663_vm11, %v573_v36, %v662_v63 }
 0x12e   : > { %v667_v5 = vsel %vm665_vm12, %v666_v2, %v664_v4  ;;  %v685_v1 = vsel %vm684_vm13, %v576_v37, %v683_v3 }
 0x12f   : > { %v1061_v6 = vpop.eup %1060  ;;  %701 = vst [vmem:[%s1382_s20 + $0x60] sm:$0xff] %v667_v5  ;;  %v688_v7 = vsel %vm686_vm14, %v687_v0, %v685_v1 }
 0x130   : > { %704 = vst [vmem:[%s1382_s20 + $0x78] sm:$0xff] %v688_v7  ;;  %v676_v8 = vmul.f32 %v1061_v6, %v575_v49 }
 0x132   : > { %v678_v12 = vsel %vm677_vm15, %v575_v49, %v676_v8 }
 0x133   : > { %v681_v13 = vsel %vm679_vm0, %v680_v9, %v678_v12 }
 0x134   : > { %703 = vst [vmem:[%s1382_s20 + $0x70] sm:$0xff] %v681_v13 }
 0x135   : > { %1075 = shalt.err (!%p1072_p5)
}
 0x136   : > { %s1076_s4 = scalar_lea.hbm %s1485_s27, 2048  ;;  %s1080_s7 = scalar_lea.hbm %s1540_s2, 4096 }
 0x137   : > { %p1077_p6 = scmp.ne.s32.totalorder %s1485_s27, %s1076_s4  ;;  %p1081_p10 = scmp.lt.u32.totalorder %s1485_s27, %s1540_s2 }
 0x138   : > { %p1082_p11 = scmp.lt.u32.totalorder %s1080_s7, %s1076_s4  ;;  %p1084_p13 = scmp.lt.u32.totalorder %s1076_s4, %s1485_s27 }
 0x139   : > { %p1078_p7 = pnand %p1077_p6, %p1200_p4 }
 0x13a   : > { %p1083_p12 = por %p1082_p11, %p1081_p10 }
 0x13b   : > { %p1079_p9 = pneg %p1078_p7 }
 0x13c   : > { %p1085_p0 = por %p1084_p13, %p1083_p12 }
 0x13e   : > { %p1086_p1 = pnand %p1085_p0, %p1079_p9 }
 0x140   : > { %1089 = shalt.err (!%p1086_p1)
}
 0x141   : > { %s1143_s16 = smov 128   ;;  %s1144_s18 = smov 8  }
 0x142   : > { %973 = dma.vmem_to_hbm [thread:$0]  (%p1200_p4), %s1487_s24, 2048, %s1485_s27, %s1492_s12, %s1143_s16, %s1143_s16, %s1144_s18  }
 0x143 PF: > { %p979_p2 = scmp.ge.s32.totalorder %s1140_s14, 2  ;;  %s735_s20 = sand.u32 1, %s1120_s9  }
 0x144   : > { %s736_s23 = scalar_lea.sflag [#allocation3], %s735_s20 }
 0x145   : > { %p976_p3 = pnand %p979_p2, %p1207_p8 }
 0x147   : > { %1115 = dma.done.wait (!%p976_p3), %s736_s23, 2048  }
 0x148   : > { %1117 = vsyncadd (!%p976_p3), %s736_s23, 4294965248  ;;  %s15_s14 = sadd.s32 1, %s1140_s14   ;;  %s1543_s9 = smov %s1124_s10 }
 0x149   : > { %p12_p5 = scmp.ge.s32.totalorder %s15_s14, 4   ;;  %s1544_s10 = smov %s1128_s11 }
 0x14a   : > { %s1545_s11 = smov %s1213_s22  ;;  %s1546_s12 = smov %s1136_s13 }
 0x14b   : > { %s1547_s13 = smov %s1549_s17  ;;  %14 = sbr.rel (!%p12_p5) target bundleno = 4 (0x4), region = 63 }
 0x152   :  { %741 = vsyncpa [#allocation3], 1 }
 0x153   :  { %743 = vsyncpa [#allocation3 + $0x1], 1 }

</bundles_post_ra>
